<compile_context>
chip_gen: v7x
topology: tpu7x:2x2x1
jax: 0.10.0
libtpu: 0.0.40
codegen_flags: <defaults>
</compile_context>

<pallas_src>
import functools

import jax
import jax.numpy as jnp
from jax.experimental import pallas as pl
from jax.experimental.pallas import tpu as pltpu


def _round_up(a, b):
    return -(-a // b) * b


def _ce_partial_kernel(x_ref, t_ref, out_ref, acc_ref, *, pixels, sp,
                       inner_blocks, full_blocks, needs_tail,
                       total_grid_blocks):
    """Accumulate per-position CE partial sums for one (batch, pixel-chunk).

    x_ref   : (1, C, sp, 128) logits tile (C is a major dim -> VPU-only reduce)
    t_ref   : (1, 1, sp, 128) integer targets tile
    out_ref : (1, 1, out_rows, 128) partial sums, written once at the last step
    acc_ref : (sp, 128) f32 VMEM scratch, resident across the inner grid axis
    """
    c = pl.program_id(1)
    j = pl.program_id(2)
    gblk = c * inner_blocks + j          # global pixel-block index

    @pl.when(j == 0)
    def _init():
        acc_ref[...] = jnp.zeros_like(acc_ref)

    x = x_ref[0].astype(jnp.float32)     # (C, sp, 128)
    t = t_ref[0, 0].astype(jnp.int32)    # (sp, 128)

    # Numerically-stable per-pixel log-softmax cross entropy; every reduction
    # is over the leading class axis -> elementwise across vregs (VPU); exp on
    # the EUP slot.
    x_max = jnp.max(x, axis=0)                                     # (sp, 128)
    lse = jnp.log(jnp.sum(jnp.exp(x - x_max), axis=0)) + x_max     # (sp, 128)
    cls = jax.lax.broadcasted_iota(jnp.int32, x.shape, 0)          # (C, sp, 128)
    # Targets outside [0, C) would silently contribute lse (documented assumption).
    x_t = jnp.sum(jnp.where(cls == t, x, 0.0), axis=0)             # (sp, 128)
    ce = lse - x_t                                                 # (sp, 128)

    if (not needs_tail) and (total_grid_blocks == full_blocks):
        # Every grid block is fully in range: plain accumulate, no masking.
        acc_ref[...] += ce
    else:
        @pl.when(gblk < full_blocks)
        def _acc_full():
            acc_ref[...] += ce

        if needs_tail:
            @pl.when(gblk == full_blocks)
            def _acc_tail():
                row = jax.lax.broadcasted_iota(jnp.int32, ce.shape, 0)
                lane = jax.lax.broadcasted_iota(jnp.int32, ce.shape, 1)
                pix = gblk * (sp * 128) + row * 128 + lane
                # Garbage / padded lanes are discarded *before* accumulation.
                acc_ref[...] += jnp.where(pix < pixels, ce, 0.0)
        # Blocks with gblk beyond the last real block are skipped entirely.

    @pl.when(j == pl.num_programs(2) - 1)
    def _finalize():
        acc = acc_ref[...]
        if sp % 8 == 0 and sp > 8:
            # Fold to (8, 128): tile-aligned reshape + elementwise adds (VPU);
            # keeps the output block + HBM writeback at a few KB.
            acc = acc.reshape(sp // 8, 8, 128).sum(axis=0)
        out_ref[...] = acc[None, None]


def _default_vmem_budget_bytes():
    """Per-step (double-buffered) block budget; safe on v5e/v6e/v7x."""
    cap = 64 << 20
    try:
        cap = int(pltpu.get_tpu_info().vmem_capacity_bytes)
    except Exception:
        pass
    return max(4 << 20, min(16 << 20, cap // 4))


def _choose_tiling(R, C, x_item, t_item, n_batch, budget_bytes, block_rows):
    """Pick (sp rows per block, n_chunks, inner_blocks, total_blocks)."""
    # Sublane alignment so every input block's (rows, 128) face is a multiple
    # of its dtype's native tile: f32/i32 -> 8, bf16/i16 -> 16, i8 -> 32.
    align = max(8 * (4 // x_item), 8 * (4 // t_item))
    # Padded, double-buffered bytes per block row of 128 pixels
    # (logits + targets double-buffered, plus the f32 accumulator scratch).
    per_row = 2 * C * 128 * x_item + 2 * 128 * t_item + 128 * 4
    if block_rows is None:
        sp_cap = max(align, (budget_bytes // per_row) // align * align)
    else:
        sp_cap = max(1, int(block_rows))

    # v7x megacore: if the batch axis alone won't split evenly across the two
    # TensorCores, add a parallel pixel-chunk axis (harmless on v5e/v6e).
    n_chunks = 1 if (n_batch % 2 == 0) else 2
    if R < 2 * align:
        n_chunks = 1

    rows_per_chunk = -(-R // n_chunks)
    if n_chunks == 1 and R <= sp_cap:
        sp = R                                   # single full-extent block
    else:
        sp = min(sp_cap, rows_per_chunk)
        sp = max(align, (sp // align) * align)
        sp = min(sp, R)

    total_blocks = -(-R // sp)
    n_chunks = min(n_chunks, total_blocks)
    inner_blocks = -(-total_blocks // n_chunks)
    return sp, n_chunks, inner_blocks, total_blocks


def focal_loss(logits_nchw, target_nhw, *, alpha=1.0, gamma=2.0,
               block_rows=None, vmem_budget_bytes=None):
    """Scalar focal loss matching the PyTorch FocalLoss.forward (reduce=True).

    Accepts f32 or bf16 logits (bf16 halves the dominant HBM stream) and any
    integer target dtype (int8/int16 shrink the secondary stream); all math is
    done in f32 inside the kernel.
    """
    N, C, H, W = logits_nchw.shape
    P = H * W

    t = target_nhw
    if (not jnp.issubdtype(t.dtype, jnp.integer)) or jnp.dtype(t.dtype).itemsize > 4:
        t = t.astype(jnp.int32)
    x_item = jnp.dtype(logits_nchw.dtype).itemsize
    t_item = jnp.dtype(t.dtype).itemsize

    R = pl.cdiv(P, 128)          # pixel rows of 128 lanes
    P_pad = R * 128

    # Free reshapes: NCHW -> (N, C, P) -> (N, C, R, 128); no transpose.
    x = logits_nchw.reshape(N, C, P)
    t = t.reshape(N, 1, P)
    if P_pad != P:
        # TODO(synk): this pad is one extra copy of the logits; keep H*W a
        # multiple of 128 to stay on the zero-copy path.
        x = jnp.pad(x, ((0, 0), (0, 0), (0, P_pad - P)))
        t = jnp.pad(t, ((0, 0), (0, 0), (0, P_pad - P)))
    x = x.reshape(N, C, R, 128)
    t = t.reshape(N, 1, R, 128)

    if vmem_budget_bytes is None:
        vmem_budget_bytes = _default_vmem_budget_bytes()
    sp, n_chunks, inner_blocks, total_blocks = _choose_tiling(
        R, C, x_item, t_item, N, vmem_budget_bytes, block_rows)

    block_pixels = sp * 128
    full_blocks = P // block_pixels           # fully in-range blocks
    needs_tail = (P % block_pixels) != 0      # one partially-masked block
    total_grid_blocks = n_chunks * inner_blocks
    out_rows = 8 if sp % 8 == 0 else sp
    last_blk = total_blocks - 1

    # Explicit scoped-VMEM limit from the padded, double-buffered footprint.
    x_align = 8 * (4 // x_item)
    t_align = 8 * (4 // t_item)
    footprint = (2 * C * _round_up(sp, x_align) * 128 * x_item
                 + 2 * _round_up(sp, t_align) * 128 * t_item
                 + 2 * _round_up(out_rows, 8) * 128 * 4
                 + _round_up(sp, 8) * 128 * 4)
    vmem_limit = int(max(32 << 20, footprint + (8 << 20)))

    kernel = functools.partial(
        _ce_partial_kernel, pixels=P, sp=sp, inner_blocks=inner_blocks,
        full_blocks=full_blocks, needs_tail=needs_tail,
        total_grid_blocks=total_grid_blocks)

    def in_map(n, c, j):
        # Clamp so over-provisioned (chunk, inner) steps never DMA out of
        # bounds; those steps are skipped in the accumulation above.
        return (n, 0, jnp.minimum(c * inner_blocks + j, last_blk), 0)

    def out_map(n, c, j):
        return (n, c, 0, 0)

    partials = pl.pallas_call(
        kernel,
        out_shape=jax.ShapeDtypeStruct((N, n_chunks, out_rows, 128), jnp.float32),
        grid_spec=pltpu.PrefetchScalarGridSpec(
            num_scalar_prefetch=0,
            grid=(N, n_chunks, inner_blocks),
            in_specs=[
                pl.BlockSpec((1, C, sp, 128), in_map),
                pl.BlockSpec((1, 1, sp, 128), in_map),
            ],
            out_specs=pl.BlockSpec((1, 1, out_rows, 128), out_map),
            scratch_shapes=[pltpu.VMEM((sp, 128), jnp.float32)],
        ),
        compiler_params=pltpu.CompilerParams(
            dimension_semantics=("parallel", "parallel", "arbitrary"),
            vmem_limit_bytes=vmem_limit,
        ),
    )(x, t)

    # Tiny final reduction + focal transform (plain JAX; a few scalar ops).
    mean_ce = jnp.sum(partials) / jnp.float32(N * P)   # F.cross_entropy 'mean'
    pt = jnp.exp(-mean_ce)
    return jnp.float32(alpha) * (1.0 - pt) ** jnp.float32(gamma) * mean_ce


def _focal_loss_ref(logits_nchw, target_nhw, alpha=1.0, gamma=2.0):
    """Pure-JAX reference mirroring the PyTorch module."""
    N, C, H, W = logits_nchw.shape
    x = jnp.transpose(logits_nchw, (0, 2, 3, 1)).reshape(-1, C).astype(jnp.float32)
    t = target_nhw.reshape(-1).astype(jnp.int32)
    logp = jax.nn.log_softmax(x, axis=-1)
    ce = -jnp.take_along_axis(logp, t[:, None], axis=-1)[:, 0]
    bce = jnp.mean(ce)
    pt = jnp.exp(-bce)
    return alpha * (1.0 - pt) ** gamma * bce


if __name__ == "__main__":
    key = jax.random.PRNGKey(0)
    ks = jax.random.split(key, 8)

    # 1) f32 logits / int32 targets, H*W a multiple of 128 (zero-copy path).
    N, C, H, W = 2, 4, 16, 16
    logits = jax.random.normal(ks[0], (N, C, H, W), dtype=jnp.float32)
    target = jax.random.randint(ks[1], (N, H, W), 0, C, dtype=jnp.int32)
    out = jax.block_until_ready(focal_loss(logits, target, alpha=1.0, gamma=2.0))
    ref = _focal_loss_ref(logits, target, alpha=1.0, gamma=2.0)
    assert jnp.allclose(out, ref, rtol=1e-5, atol=1e-5), (out, ref)

    # 2) bf16 logits / int8 targets, ragged H*W (padded + masked tail block).
    N2, C2, H2, W2 = 2, 4, 15, 20
    logits2 = jax.random.normal(ks[2], (N2, C2, H2, W2), dtype=jnp.bfloat16)
    target2 = jax.random.randint(ks[3], (N2, H2, W2), 0, C2,
                                 dtype=jnp.int32).astype(jnp.int8)
    out2 = jax.block_until_ready(focal_loss(logits2, target2, alpha=0.5, gamma=2.0))
    ref2 = _focal_loss_ref(logits2.astype(jnp.float32), target2, alpha=0.5, gamma=2.0)
    assert jnp.allclose(out2, ref2, rtol=1e-4, atol=1e-4), (out2, ref2)

    # 3) N=1: parallel pixel-chunk axis (v7x megacore) + lane-folded output.
    N3, C3, H3, W3 = 1, 4, 64, 64
    logits3 = jax.random.normal(ks[4], (N3, C3, H3, W3), dtype=jnp.float32)
    target3 = jax.random.randint(ks[5], (N3, H3, W3), 0, C3, dtype=jnp.int32)
    out3 = jax.block_until_ready(focal_loss(logits3, target3, alpha=1.0, gamma=2.0))
    ref3 = _focal_loss_ref(logits3, target3, alpha=1.0, gamma=2.0)
    assert jnp.allclose(out3, ref3, rtol=1e-5, atol=1e-5), (out3, ref3)

    # 4) Multi-step inner accumulation + pl.when-gated tail mask (forced tile).
    N4, C4, H4, W4 = 2, 4, 48, 48
    logits4 = jax.random.normal(ks[6], (N4, C4, H4, W4), dtype=jnp.float32)
    target4 = jax.random.randint(ks[7], (N4, H4, W4), 0, C4, dtype=jnp.int32)
    out4 = jax.block_until_ready(
        focal_loss(logits4, target4, alpha=1.0, gamma=2.0, block_rows=8))
    ref4 = _focal_loss_ref(logits4, target4, alpha=1.0, gamma=2.0)
    assert jnp.allclose(out4, ref4, rtol=1e-5, atol=1e-5), (out4, ref4)

    print("KERNEL_OK")
</pallas_src>

<mosaic_0001>
module attributes {stable_mosaic.version = 11 : i64} {
  func.func @_ce_partial_kernel(%arg0: i32, %arg1: i32, %arg2: i32, %arg3: memref<1x4x2x128xf32, #tpu.memory_space<vmem>>, %arg4: memref<1x1x2x128xi32, #tpu.memory_space<vmem>>, %arg5: memref<1x1x2x128xf32, #tpu.memory_space<vmem>>, %arg6: memref<2x128xf32, #tpu.memory_space<vmem>>) attributes {dimension_semantics = [#tpu.dimension_semantics<parallel>, #tpu.dimension_semantics<parallel>, #tpu.dimension_semantics<arbitrary>], iteration_bounds = array<i64: 2, 1, 1>, scalar_prefetch = 0 : i64, scratch_operands = 1 : i64, tpu.core_type = #tpu.core_type<tc>, window_params = [{transform_indices = @transform_0, window_bounds = array<i64: 1, 4, 2, 128>}, {transform_indices = @transform_1, window_bounds = array<i64: 1, 1, 2, 128>}, {transform_indices = @transform_2, window_bounds = array<i64: 1, 1, 2, 128>}]} {
    %c0_i32 = arith.constant 0 : i32
    %0 = arith.cmpi eq, %arg2, %c0_i32 : i32
    %1 = arith.extui %0 : i1 to i32
    %c0_i32_0 = arith.constant 0 : i32
    %2 = arith.cmpi ne, %1, %c0_i32_0 : i32
    scf.if %2 {
      %cst_17 = arith.constant 0.000000e+00 : f32
      %29 = vector.broadcast %cst_17 : f32 to vector<2x128xf32>
      %c0_18 = arith.constant 0 : index
      %c0_19 = arith.constant 0 : index
      %30 = vector.load %arg6[%c0_18, %c0_19] : memref<2x128xf32, #tpu.memory_space<vmem>>, vector<2x128xf32>
      tpu.vector_store %arg6[%c0_18, %c0_19], %29 {strides = array<i32>} : memref<2x128xf32, #tpu.memory_space<vmem>>, vector<2x128xf32>,
    } else {
    }
    %c0 = arith.constant 0 : index
    %c0_1 = arith.constant 0 : index
    %c0_2 = arith.constant 0 : index
    %c0_3 = arith.constant 0 : index
    %3 = vector.load %arg3[%c0, %c0_1, %c0_2, %c0_3] : memref<1x4x2x128xf32, #tpu.memory_space<vmem>>, vector<1x4x2x128xf32>
    %4 = vector.shape_cast %3 : vector<1x4x2x128xf32> to vector<4x2x128xf32>
    %c0_4 = arith.constant 0 : index
    %c0_5 = arith.constant 0 : index
    %c0_6 = arith.constant 0 : index
    %c0_7 = arith.constant 0 : index
    %5 = vector.load %arg4[%c0_4, %c0_5, %c0_6, %c0_7] : memref<1x1x2x128xi32, #tpu.memory_space<vmem>>, vector<1x1x2x128xi32>
    %6 = vector.shape_cast %5 : vector<1x1x2x128xi32> to vector<2x128xi32>
    %cst = arith.constant dense<0xFF800000> : vector<2x128xf32>
    %7 = vector.multi_reduction <maximumf>, %4, %cst [0] : vector<4x2x128xf32> to vector<2x128xf32>
    %8 = vector.shape_cast %7 : vector<2x128xf32> to vector<1x2x128xf32>
    %9 = vector.broadcast %8 : vector<1x2x128xf32> to vector<4x2x128xf32>
    %10 = arith.subf %4, %9 : vector<4x2x128xf32>
    %11 = math.exp %10 : vector<4x2x128xf32>
    %cst_8 = arith.constant dense<0.000000e+00> : vector<2x128xf32>
    %12 = vector.multi_reduction <add>, %11, %cst_8 [0] : vector<4x2x128xf32> to vector<2x128xf32>
    %13 = math.log %12 : vector<2x128xf32>
    %14 = arith.addf %13, %7 : vector<2x128xf32>
    %15 = tpu.iota {dimensions = array<i32: 0>} : vector<4x2x128xi32>
    %16 = vector.shape_cast %6 : vector<2x128xi32> to vector<1x2x128xi32>
    %17 = vector.broadcast %16 : vector<1x2x128xi32> to vector<4x2x128xi32>
    %18 = arith.cmpi eq, %15, %17 : vector<4x2x128xi32>
    %cst_9 = arith.constant 0.000000e+00 : f32
    %19 = vector.broadcast %cst_9 : f32 to vector<4x2x128xf32>
    %20 = arith.select %18, %4, %19 : vector<4x2x128xi1>, vector<4x2x128xf32>
    %cst_10 = arith.constant dense<0.000000e+00> : vector<2x128xf32>
    %21 = vector.multi_reduction <add>, %20, %cst_10 [0] : vector<4x2x128xf32> to vector<2x128xf32>
    %22 = arith.subf %14, %21 : vector<2x128xf32>
    %c0_11 = arith.constant 0 : index
    %c0_12 = arith.constant 0 : index
    %23 = vector.load %arg6[%c0_11, %c0_12] : memref<2x128xf32, #tpu.memory_space<vmem>>, vector<2x128xf32>
    %24 = arith.addf %23, %22 : vector<2x128xf32>
    %c0_13 = arith.constant 0 : index
    %c0_14 = arith.constant 0 : index
    %25 = vector.load %arg6[%c0_13, %c0_14] : memref<2x128xf32, #tpu.memory_space<vmem>>, vector<2x128xf32>
    tpu.vector_store %arg6[%c0_13, %c0_14], %24 {strides = array<i32>} : memref<2x128xf32, #tpu.memory_space<vmem>>, vector<2x128xf32>,
    %c0_i32_15 = arith.constant 0 : i32
    %26 = arith.cmpi eq, %arg2, %c0_i32_15 : i32
    %27 = arith.extui %26 : i1 to i32
    %c0_i32_16 = arith.constant 0 : i32
    %28 = arith.cmpi ne, %27, %c0_i32_16 : i32
    scf.if %28 {
      %c0_17 = arith.constant 0 : index
      %c0_18 = arith.constant 0 : index
      %29 = vector.load %arg6[%c0_17, %c0_18] : memref<2x128xf32, #tpu.memory_space<vmem>>, vector<2x128xf32>
      %30 = vector.shape_cast %29 : vector<2x128xf32> to vector<1x1x2x128xf32>
      %c0_19 = arith.constant 0 : index
      %c0_20 = arith.constant 0 : index
      %c0_21 = arith.constant 0 : index
      %c0_22 = arith.constant 0 : index
      %31 = vector.load %arg5[%c0_19, %c0_20, %c0_21, %c0_22] : memref<1x1x2x128xf32, #tpu.memory_space<vmem>>, vector<1x1x2x128xf32>
      tpu.vector_store %arg5[%c0_19, %c0_20, %c0_21, %c0_22], %30 {strides = array<i32>} : memref<1x1x2x128xf32, #tpu.memory_space<vmem>>, vector<1x1x2x128xf32>,
    } else {
    }
    return
  }
  func.func @transform_0(%arg0: i32, %arg1: i32, %arg2: i32) -> (i32, i32, i32, i32) {
    %c1_i32 = arith.constant 1 : i32
    %0 = arith.muli %arg1, %c1_i32 : i32
    %1 = arith.addi %0, %arg2 : i32
    %c0_i32 = arith.constant 0 : i32
    %2 = arith.minsi %1, %c0_i32 : i32
    %c0_i32_0 = arith.constant 0 : i32
    %c0_i32_1 = arith.constant 0 : i32
    %c0_i32_2 = arith.constant 0 : i32
    return %arg0, %c0_i32_0, %2, %c0_i32_1 : i32, i32, i32, i32
  }
  func.func @transform_1(%arg0: i32, %arg1: i32, %arg2: i32) -> (i32, i32, i32, i32) {
    %c1_i32 = arith.constant 1 : i32
    %0 = arith.muli %arg1, %c1_i32 : i32
    %1 = arith.addi %0, %arg2 : i32
    %c0_i32 = arith.constant 0 : i32
    %2 = arith.minsi %1, %c0_i32 : i32
    %c0_i32_0 = arith.constant 0 : i32
    %c0_i32_1 = arith.constant 0 : i32
    %c0_i32_2 = arith.constant 0 : i32
    return %arg0, %c0_i32_0, %2, %c0_i32_1 : i32, i32, i32, i32
  }
  func.func @transform_2(%arg0: i32, %arg1: i32, %arg2: i32) -> (i32, i32, i32, i32) {
    %c0_i32 = arith.constant 0 : i32
    %c0_i32_0 = arith.constant 0 : i32
    %c0_i32_1 = arith.constant 0 : i32
    return %arg0, %arg1, %c0_i32, %c0_i32_0 : i32, i32, i32, i32
  }
}

</mosaic_0001>

<bundles_post_ra>
// kernel: tpu_custom_call.1
= control target key start
LH: loop header
LB: loop body
LE: loop exit
PB: predicated region body
PF: predicated region fallthrough
CT: control target
= control target key end

     0   :  { %7 = vsyncpa [#allocation4], 0  ;;  %s935_s0 = inlined_call_operand.hbm [shape: f32[2,4,2,128], index: 0, kind: input, shape index: {}]   ;;  %s936_s1 = inlined_call_operand.hbm [shape: s32[2,1,2,128], index: 1, kind: input, shape index: {}]   ;;  %s937_s2 = inlined_call_operand.hbm [shape: f32[2,1,2,128], index: 2, kind: output, shape index: {}]  }
   0x1   :  { %9 = vsyncpa [#allocation4 + $0x1], 0 }
   0x2   :  { %10 = vsyncpa [#allocation7], 0 }
   0x3   :  { %12 = vsyncpa [#allocation7 + $0x1], 0 }
   0x4   :  { %13 = vsyncpa [#allocation5], 0 }
   0x5   :  { %15 = vsyncpa [#allocation5 + $0x1], 0  ;;  %s704_s9 = smov 0   ;;  %s706_s10 = smov 0  }
   0x6   :  { %s708_s11 = smov 0   ;;  %s710_s12 = smov 0  }
   0x7   :  { %s712_s13 = smov 0   ;;  %s714_s14 = smov 0  }
   0x8 LB: > { %s437_s15 = sadd.s32 4294967295, %s681_s14   ;;  %s438_s16 = sadd.s32 4294967294, %s681_s14   ;;  %s681_s14 = sphi %s714_s14, %s21_s14   ;;  %s677_s13 = sphi %s712_s13, %s956_s13   ;;  %s673_s12 = sphi %s710_s12, %s955_s12   ;;  %s669_s11 = sphi %s708_s11, %s954_s11   ;;  %s665_s10 = sphi %s706_s10, %s953_s10   ;;  %s661_s9 = sphi %s704_s9, %s952_s9  }
   0x9   : > { %s40_s17 = sadd.s32 1, %s677_s13  ;;  %s55_s18 = sadd.s32 1, %s669_s11 }
   0xa   : > { %p42_p0 = scmp.ge.s32.totalorder %s40_s17, 2  ;;  %p62_p1 = scmp.ne.s32.totalorder %s669_s11, %s665_s10 }
   0xb   : > { %p63_p2 = scmp.eq.s32.totalorder %s681_s14, 0  ;;  %p68_p3 = scmp.ne.s32.totalorder %s665_s10, %s661_s9 }
   0xc   : > { %s958_s17 = smov (%p42_p0, %s40_s17), 0  ;;  %p69_p5 = scmp.eq.s32.totalorder %s437_s15, 0 }
   0xd   : > { %p745_p4 = por %p63_p2, %p62_p1  ;;  %s50_s20 = ssub.s32 %s677_s13, %s958_s17 }
   0xe   : > { %p128_p6 = scmp.eq.s32.totalorder %s437_s15, 1  ;;  %p53_p7 = scmp.eq.s32.totalorder %s50_s20, 0 }
   0xf   : > { %p751_p8 = por %p69_p5, %p68_p3  ;;  %p134_p10 = scmp.eq.s32.totalorder %s438_s16, 1 }
  0x10   : > { %p755_p9 = por %p128_p6, %p62_p1  ;;  %p472_p13 = scmp.lt.s32.totalorder %s681_s14, 2 }
  0x11   : > { %s941_s21 = scalar_select %p751_p8, 1, 0 }
  0x12   : > { %s942_s22 = scalar_select %p755_p9, 1, 0 }
  0x13   : > { %s760_s23 = scalar_select %p53_p7, %s669_s11, %s55_s18  }
  0x14   : > { %p762_p11 = por %p134_p10, %p68_p3  ;;  %s769_s25 = sand.u32 1, %s669_s11  }
  0x15   : > { %s441_s26 = sshll.u32 %s769_s25, 3  ;;  %s454_s27 = sshll.u32 %s677_s13, 7 }
  0x16   : > { %s943_s24 = scalar_select %p762_p11, 1, 0 }
  0x17   : > { %s776_s30 = scalar_lea.hbm %s935_s0, %s454_s27  ;;  %s158_s3 = scalar_lea.vmem [#allocation3], %s441_s26 }
  0x18   : > { %s169_s4 = sshll.u32 %s158_s3, 4  ;;  %p782_p0 = pnand %p472_p13, %p745_p4  ;;  %s778_s4 = int_to_ptr.vmem [resolvable:$true] %s169_s4 }
  0x19   : > { %s155_s6 = scalar_lea.sflag [#allocation4], %s769_s25  ;;  %s535_s7 = scalar_lea.hbm %s776_s30, 128 }
  0x1a   : > { %p536_p2 = scmp.ne.s32.totalorder %s776_s30, %s535_s7  ;;  %p537_p3 = pneg %p782_p0 }
  0x1b   : > { %s540_s16 = scalar_lea.hbm %s935_s0, 256  ;;  %p541_p4 = scmp.lt.u32.totalorder %s776_s30, %s935_s0 }
  0x1c   : > { %p538_p5 = pnand %p537_p3, %p536_p2  ;;  %p542_p7 = scmp.lt.u32.totalorder %s540_s16, %s535_s7 }
  0x1d   : > { %p544_p13 = scmp.lt.u32.totalorder %s535_s7, %s776_s30 }
  0x1e   : > { %p539_p6 = pneg %p538_p5  ;;  %p543_p10 = por %p542_p7, %p541_p4 }
  0x20   : > { %p545_p12 = por %p544_p13, %p543_p10 }
  0x22   : > { %p546_p1 = pnand %p545_p12, %p539_p6 }
  0x24   : > { %549 = shalt.err (!%p546_p1)
}
  0x25   : > { %s550_s20 = scalar_lea.vmem %s778_s4, 128  ;;  %s683_s26 = smov [#allocation3]  }
  0x26   : > { %p551_p2 = scmp.ne.s32.totalorder %s778_s4, %s550_s20  ;;  %s555_s27 = sshll.u32 %s683_s26, 4  ;;  %s556_s27 = int_to_ptr.vmem [resolvable:$false] %s555_s27 }
  0x27   : > { %s557_s28 = scalar_lea.vmem %s556_s27, 256  ;;  %p558_p9 = scmp.lt.s32.totalorder %s778_s4, %s556_s27 }
  0x28   : > { %p553_p5 = pnand %p551_p2, %p537_p3  ;;  %p559_p4 = scmp.lt.s32.totalorder %s557_s28, %s550_s20 }
  0x2a   : > { %p554_p11 = pneg %p553_p5  ;;  %p560_p7 = por %p559_p4, %p558_p9 }
  0x2c   : > { %p561_p10 = pnand %p560_p7, %p554_p11 }
  0x2e   : > { %564 = shalt.err (!%p561_p10)
}
  0x2f   : > { %s684_s29 = smov 32   ;;  %s685_s3 = smov 2  }
  0x30   : > { %464 = dma.hbm_to_vmem [thread:$0]  (!%p782_p0), %s776_s30, 128, %s778_s4, %s155_s6, %s684_s29, %s684_s29, %s685_s3  }
  0x31   : > { %p199_p12 = scmp.lt.s32.totalorder %s681_s14, 3  ;;  %s444_s7 = sshll.u32 %s769_s25, 1 }
  0x32   : > { %s445_s8 = sshll.u32 %s677_s13, 5  ;;  %p945_p9 = scmp.ge.s32.totalorder %s681_s14, 1 }
  0x33   : > { %s827_s19 = scalar_lea.hbm %s936_s1, %s445_s8  ;;  %s183_s20 = scalar_lea.vmem [#allocation6], %s444_s7 }
  0x34   : > { %p820_p11 = pnand %p945_p9, %p199_p12  ;;  %s194_s26 = sshll.u32 %s183_s20, 4  ;;  %s195_s26 = int_to_ptr.vmem [resolvable:$true] %s194_s26 }
  0x35   : > { %s180_s30 = scalar_lea.sflag [#allocation7], %s769_s25  ;;  %s565_s4 = scalar_lea.hbm %s827_s19, 32 }
  0x36   : > { %s946_s15 = scalar_select %p820_p11, 1, 0 }
  0x37   : > { %p566_p1 = scmp.ne.s32.totalorder %s827_s19, %s565_s4  ;;  %s570_s28 = scalar_lea.hbm %s936_s1, 64 }
  0x38   : > { %p571_p2 = scmp.lt.u32.totalorder %s827_s19, %s936_s1  ;;  %p572_p5 = scmp.lt.u32.totalorder %s570_s28, %s565_s4 }
  0x39   : > { %p568_p6 = pnand %p566_p1, %p537_p3  ;;  %p574_p7 = scmp.lt.u32.totalorder %s565_s4, %s827_s19 }
  0x3a   : > { %p573_p4 = por %p572_p5, %p571_p2 }
  0x3b   : > { %p569_p13 = pneg %p568_p6 }
  0x3c   : > { %p575_p10 = por %p574_p7, %p573_p4 }
  0x3e   : > { %p576_p12 = pnand %p575_p10, %p569_p13 }
  0x40   : > { %579 = shalt.err (!%p576_p12)
}
  0x41   : > { %s580_s25 = scalar_lea.vmem %s195_s26, 32  ;;  %s686_s7 = smov [#allocation6]  }
  0x42   : > { %p581_p9 = scmp.ne.s32.totalorder %s195_s26, %s580_s25  ;;  %s585_s8 = sshll.u32 %s686_s7, 4  ;;  %s586_s8 = int_to_ptr.vmem [resolvable:$false] %s585_s8 }
  0x43   : > { %s587_s16 = scalar_lea.vmem %s586_s8, 64  ;;  %p588_p8 = scmp.lt.s32.totalorder %s195_s26, %s586_s8 }
  0x44   : > { %p583_p1 = pnand %p581_p9, %p537_p3  ;;  %p589_p11 = scmp.lt.s32.totalorder %s587_s16, %s580_s25 }
  0x46   : > { %p584_p6 = pneg %p583_p1  ;;  %p590_p2 = por %p589_p11, %p588_p8 }
  0x48   : > { %p591_p5 = pnand %p590_p2, %p584_p6 }
  0x4a   : > { %594 = shalt.err (!%p591_p5)
}
  0x4b   : > { %467 = dma.hbm_to_vmem [thread:$0]  (!%p782_p0), %s827_s19, 32, %s195_s26, %s180_s30  }
  0x4c   : > { %p947_p13 = scmp.ne.s32.totalorder %s946_s15, 0 }
  0x4d   : > { %s852_s18 = sand.u32 (!%p947_p13), 1, %s665_s10   ;;  %p948_p3 = scmp.ne.s32.totalorder (!%p947_p13), %s941_s21, 0 }
  0x4e   : > { %203 = sbr.rel (%p947_p13) target bundleno = 161 (0xa1), region = 28  ;;  %s447_s20 = sshll.u32 (!%p947_p13), %s852_s18, 3 }
  0x4f   : > { %s206_s4 = scalar_lea.sflag (!%p947_p13), [#allocation4], %s852_s18  ;;  %s209_s6 = scalar_lea.vmem (!%p947_p13), [#allocation3], %s447_s20 }
  0x55   : > { %648 = dma.done.wait (%p948_p3), %s206_s4, 128  }
  0x56   : > { %650 = vsyncadd (%p948_p3), %s206_s4, 4294967168  ;;  %s448_s5 = sshll.u32 %s852_s18, 1  ;;  %s215_s15 = scalar_lea.sflag [#allocation7], %s852_s18 }
  0x57   : > { %s218_s19 = scalar_lea.vmem [#allocation6], %s448_s5 }
  0x58   : > { %652 = dma.done.wait (%p948_p3), %s215_s15, 32  }
  0x59   : > { %654 = vsyncadd (%p948_p3), %s215_s15, 4294967264  ;;  %v687_v0 = vmov 0.0   ;;  %vm260_vm0 = vcmask 1041408   ;;  %v255_v1 = vld [vmem:[%s209_s6] sm:$0x3]  ;;  %s243_s21 = scalar_lea.vmem [#allocation8], %s448_s5 }
  0x5a   : > { %254 = vst [vmem:[#allocation2] sm:$0x3] %v687_v0  ;;  %v256_v2 = vld [vmem:[%s209_s6 + $0x2] sm:$0x3]  ;;  %v257_v3 = vld [vmem:[%s209_s6 + $0x4] sm:$0x3] }
  0x5b   : > { %v258_v4 = vld [vmem:[%s209_s6 + $0x6] sm:$0x3]  ;;  %v261_v5 = vsel %vm260_vm0, %v255_v1, -inf  ;;  %v262_v6 = vsel %vm260_vm0, %v256_v2, -inf  ;;  %v263_v7 = vsel %vm260_vm0, %v257_v3, -inf  ;;  %s329_s26 = sshll.u32 %s243_s21, 4  ;;  %s883_s26 = int_to_ptr.vmem [resolvable:$true] %s329_s26 }
  0x5c   : > { %v264_v8 = vsel %vm260_vm0, %v258_v4, -inf  ;;  %v265_v9 = vmax.f32 %v261_v5, %v262_v6  ;;  %v259_v21 = vld [vmem:[%s218_s19] sm:$0x3]  ;;  %s451_s30 = sshll.u32 %s673_s12, 5  ;;  %s315_s3 = scalar_lea.sflag [#allocation5], %s852_s18 }
  0x5d   : > { %v266_v10 = vmax.f32 %v263_v7, %v264_v8  ;;  %vm290_vm1 = vcmp.eq.s32.totalorder %v259_v21, 0  ;;  %vm291_vm2 = vcmp.eq.s32.totalorder %v259_v21, 1  ;;  %vm292_vm3 = vcmp.eq.s32.totalorder %v259_v21, 2  ;;  %s888_s29 = scalar_lea.hbm %s937_s2, %s451_s30  ;;  %s595_s25 = scalar_lea.vmem %s883_s26, 32 }
  0x5e   : > { %v294_v31 = vsel %vm290_vm1, %v255_v1, 0.0  ;;  %v295_v32 = vsel %vm291_vm2, %v256_v2, 0.0  ;;  %v296_v36 = vsel %vm292_vm3, %v257_v3, 0.0  ;;  %vm293_vm4 = vcmp.eq.s32.totalorder %v259_v21, 3  ;;  %p596_p8 = scmp.ne.s32.totalorder %s883_s26, %s595_s25  ;;  %p949_p0 = scmp.ne.s32.totalorder %s942_s22, 0 }
  0x5f   : > { %v267_v11 = vmax.f32 %v265_v9, %v266_v10  ;;  %v298_v34 = vsel %vm260_vm0, %v294_v31, 0.0  ;;  %v299_v35 = vsel %vm260_vm0, %v295_v32, 0.0  ;;  %v301_v38 = vsel %vm260_vm0, %v296_v36, 0.0  ;;  %s688_s7 = smov [#allocation8]  }
  0x60   : > { %v300_v37 = vadd.f32 %v299_v35, %v298_v34  ;;  %v297_v39 = vsel %vm293_vm4, %v258_v4, 0.0  ;;  %p597_p11 = pnand %p596_p8, %p949_p0  ;;  %s599_s12 = sshll.u32 %s688_s7, 4  ;;  %s600_s12 = int_to_ptr.vmem [resolvable:$false] %s599_s12 }
  0x61   : > { %v268_v12 = vsub.f32 %v255_v1, %v267_v11  ;;  %v269_v13 = vsub.f32 %v256_v2, %v267_v11  ;;  %v270_v14 = vsub.f32 %v257_v3, %v267_v11  ;;  %v271_v15 = vsub.f32 %v258_v4, %v267_v11  ;;  %v306_v46 = vld [vmem:[#allocation2] sm:$0x3]  ;;  %s601_s8 = scalar_lea.vmem %s600_s12, 64  ;;  %p602_p7 = scmp.lt.s32.totalorder %s883_s26, %s600_s12 }
  0x62   : > { %v302_v40 = vadd.f32 %v301_v38, %v300_v37  ;;  %v303_v41 = vsel %vm260_vm0, %v297_v39, 0.0  ;;  %p598_p4 = pneg %p597_p11  ;;  %p603_p10 = scmp.lt.s32.totalorder %s601_s8, %s595_s25 }
  0x63   : > { %v272_v16 = vmul.f32 1.442695, %v268_v12  ;;  %v274_v17 = vmul.f32 1.442695, %v269_v13  ;;  %v276_v18 = vmul.f32 1.442695, %v270_v14 }
  0x64   : > { %v278_v19 = vmul.f32 1.442695, %v271_v15  ;;  %v304_v44 = vadd.f32 %v303_v41, %v302_v40  ;;  %p604_p12 = por %p603_p10, %p602_p7 }
  0x65   : > { %525 = vpow2.f32 %v272_v16 }
  0x66   : > { %527 = vpow2.f32 %v274_v17  ;;  %p605_p9 = pnand %p604_p12, %p598_p4 }
  0x67   : > { %529 = vpow2.f32 %v276_v18 }
  0x68   : > { %531 = vpow2.f32 %v278_v19 }
  0x6f   : > { %v526_v20 = vpop.eup %525 }
  0x70   : > { %v528_v22 = vpop.eup %527  ;;  %v280_v23 = vsel %vm260_vm0, %v526_v20, 0.0 }
  0x71   : > { %v530_v24 = vpop.eup %529  ;;  %v281_v25 = vsel %vm260_vm0, %v528_v22, 0.0 }
  0x72   : > { %v532_v26 = vpop.eup %531  ;;  %v282_v27 = vadd.f32 %v281_v25, %v280_v23  ;;  %v283_v28 = vsel %vm260_vm0, %v530_v24, 0.0 }
  0x73   : > { %v285_v29 = vsel %vm260_vm0, %v532_v26, 0.0 }
  0x74   : > { %v284_v30 = vadd.f32 %v283_v28, %v282_v27 }
  0x76   : > { %v286_v33 = vadd.f32 %v285_v29, %v284_v30 }
  0x78   : > { %533 = vlog2.f32 %v286_v33 }
  0x82   : > { %v534_v42 = vpop.eup %533 }
  0x83   : > { %v288_v43 = vmul.f32 0.6931472, %v534_v42 }
  0x85   : > { %v289_v45 = vadd.f32 %v288_v43, %v267_v11 }
  0x87   : > { %v305_v47 = vsub.f32 %v289_v45, %v304_v44 }
  0x89   : > { %v307_v48 = vadd.f32 %v306_v46, %v305_v47 }
  0x8b   : > { %308 = vst [vmem:[#allocation2] sm:$0x3] %v307_v48 }
  0x92   : > { %v312_v49 = vld [vmem:[#allocation2] sm:$0x3] }
  0x93   : > { %313 = vst [vmem:[%s243_s21] sm:$0x3] %v312_v49 }
  0x94   : > { %608 = shalt.err (!%p605_p9)
}
  0x95   : > { %s609_s16 = scalar_lea.hbm %s888_s29, 32  ;;  %s613_s4 = scalar_lea.hbm %s937_s2, 64 }
  0x96   : > { %p610_p1 = scmp.ne.s32.totalorder %s888_s29, %s609_s16  ;;  %p614_p5 = scmp.lt.u32.totalorder %s888_s29, %s937_s2 }
  0x97   : > { %p615_p13 = scmp.lt.u32.totalorder %s613_s4, %s609_s16  ;;  %p617_p8 = scmp.lt.u32.totalorder %s609_s16, %s888_s29 }
  0x98   : > { %p611_p6 = pnand %p610_p1, %p949_p0 }
  0x99   : > { %p616_p3 = por %p615_p13, %p614_p5 }
  0x9a   : > { %p612_p2 = pneg %p611_p6 }
  0x9b   : > { %p618_p11 = por %p617_p8, %p616_p3 }
  0x9d   : > { %p619_p4 = pnand %p618_p11, %p612_p2 }
  0x9f   : > { %622 = shalt.err (!%p619_p4)
}
  0xa0   : > { %459 = dma.vmem_to_hbm [thread:$0]  (%p949_p0), %s883_s26, 32, %s888_s29, %s315_s3  }
  0xa1 PF: > { %s341_s15 = sand.u32 1, %s661_s9   ;;  %p950_p7 = scmp.ne.s32.totalorder %s943_s24, 0 }
  0xa2   : > { %p951_p10 = scmp.ge.s32.totalorder %s681_s14, 2  ;;  %s342_s19 = scalar_lea.sflag [#allocation5], %s341_s15 }
  0xa4   : > { %p469_p12 = pnand %p951_p10, %p950_p7 }
  0xa6   : > { %656 = dma.done.wait (!%p469_p12), %s342_s19, 32  }
  0xa7   : > { %658 = vsyncadd (!%p469_p12), %s342_s19, 4294967264  ;;  %s21_s14 = sadd.s32 1, %s681_s14   ;;  %s952_s9 = smov %s665_s10 }
  0xa8   : > { %p18_p9 = scmp.ge.s32.totalorder %s21_s14, 4   ;;  %s953_s10 = smov %s669_s11 }
  0xa9   : > { %s954_s11 = smov %s760_s23  ;;  %s955_s12 = smov %s677_s13 }
  0xaa   : > { %s956_s13 = smov %s958_s17  ;;  %20 = sbr.rel (!%p18_p9) target bundleno = 8 (0x8), region = 94 }
  0xb1   :  { %347 = vsyncpa [#allocation4], 1 }
  0xb2   :  { %349 = vsyncpa [#allocation4 + $0x1], 1 }
  0xb3   :  { %350 = vsyncpa [#allocation7], 1 }
  0xb4   :  { %352 = vsyncpa [#allocation7 + $0x1], 1 }
  0xb5   :  { %353 = vsyncpa [#allocation5], 1 }
  0xb6   :  { %355 = vsyncpa [#allocation5 + $0x1], 1 }

</bundles_post_ra>
